<compile_context>
chip_gen: v5e
topology: v5e:2x2
jax: 0.10.0
libtpu: 0.0.40
codegen_flags: <defaults>
</compile_context>

<pallas_src>
import functools

import jax
import jax.numpy as jnp
from jax.experimental import pallas as pl
from jax.experimental.pallas import tpu as pltpu


def _conv1x1_bias_relu_kernel(w_ref, b_ref, x_ref, o_ref, *, cin, cout,
                              hout, wout, pad):
    """w_ref: (cout*cin,) SMEM; b_ref: (cout,) SMEM;
    x_ref: (cin, H, W) VMEM; o_ref: (cout, hout, wout) VMEM."""
    # Load each (cropped) input channel plane once; reused by all outputs.
    xs = [x_ref[ci, pl.ds(pad, hout), pl.ds(pad, wout)] for ci in range(cin)]
    for co in range(cout):
        acc = xs[0] * w_ref[co * cin + 0]
        for ci in range(1, cin):
            acc = acc + xs[ci] * w_ref[co * cin + ci]
        o_ref[co] = jnp.maximum(acc + b_ref[co], 0.0)


def conv_transpose_1x1_relu(x, weight, bias, *, padding=1, output_padding=1):
    """x: (N, Cin, H, W) f32; weight: (Cout, Cin); bias: (Cout,)."""
    N, Cin, H, W = x.shape
    Cout = weight.shape[0]
    Hout = H - 2 * padding + output_padding
    Wout = W - 2 * padding + output_padding

    # Tiny parameter vectors -> SMEM via scalar prefetch (1-D to avoid 2-D
    # SMEM padding blowup; 24 f32 pads to 128 B, 8 f32 to 32 B).
    w_flat = weight.reshape(-1).astype(jnp.float32)
    b_flat = bias.reshape(-1).astype(jnp.float32)

    kernel = functools.partial(
        _conv1x1_bias_relu_kernel,
        cin=Cin, cout=Cout, hout=Hout, wout=Wout, pad=padding)

    flops = 2 * N * Cout * Cin * Hout * Wout
    bytes_accessed = (N * Cin * H * W + N * Cout * Hout * Wout) * 4 \
        + (Cout * Cin + Cout) * 4

    return pl.pallas_call(
        kernel,
        out_shape=jax.ShapeDtypeStruct((N, Cout, Hout, Wout), jnp.float32),
        grid_spec=pltpu.PrefetchScalarGridSpec(
            num_scalar_prefetch=2,            # w_flat, b_flat -> SMEM
            grid=(N,),                        # one step per batch element
            in_specs=[
                # One full (Cin, H, W) image plane per step; last two block
                # dims equal the full array dims, so the (8,128) rule is met.
                pl.BlockSpec((None, Cin, H, W), lambda n, w, b: (n, 0, 0, 0)),
            ],
            out_specs=pl.BlockSpec((None, Cout, Hout, Wout),
                                   lambda n, w, b: (n, 0, 0, 0)),
        ),
        compiler_params=pltpu.CompilerParams(
            dimension_semantics=("parallel",)),
        cost_estimate=pl.CostEstimate(
            flops=flops, bytes_accessed=bytes_accessed, transcendentals=0),
    )(w_flat, b_flat, x)


if __name__ == "__main__":
    key = jax.random.PRNGKey(0)
    kx, kw, kb = jax.random.split(key, 3)

    # Shapes implied by the module: x (1,3,64,64), weight (8,3,1,1), bias (8,)
    x = jax.random.normal(kx, (1, 3, 64, 64), dtype=jnp.float32)
    w = jax.random.normal(kw, (8, 3, 1, 1), dtype=jnp.float32)
    b = jax.random.normal(kb, (8,), dtype=jnp.float32)

    y = conv_transpose_1x1_relu(x, w.reshape(8, 3), b)
    y = jax.block_until_ready(y)
    assert y.shape == (1, 8, 63, 63), y.shape

    # Pure-JAX reference check of the same math.
    y_ref = jnp.maximum(
        jnp.einsum("oc,nchw->nohw", w.reshape(8, 3), x[:, :, 1:, 1:])
        + b[None, :, None, None],
        0.0,
    )
    assert jnp.allclose(y, y_ref, atol=1e-5, rtol=1e-5)

    print("KERNEL_OK")
</pallas_src>

<mosaic_0001>
module attributes {stable_mosaic.version = 11 : i64} {
  func.func @_conv1x1_bias_relu_kernel(%arg0: i32, %arg1: memref<24xf32, #tpu.memory_space<smem>>, %arg2: memref<8xf32, #tpu.memory_space<smem>>, %arg3: memref<1x3x64x64xf32, #tpu.memory_space<vmem>>, %arg4: memref<1x8x63x63xf32, #tpu.memory_space<vmem>>) attributes {dimension_semantics = [#tpu.dimension_semantics<parallel>], iteration_bounds = array<i64: 1>, scalar_prefetch = 2 : i64, scratch_operands = 0 : i64, tpu.core_type = #tpu.core_type<tc>, window_params = [{transform_indices = @transform_0, window_bounds = array<i64: 1, 3, 64, 64>}, {transform_indices = @transform_1, window_bounds = array<i64: 1, 8, 63, 63>}]} {
    %c0 = arith.constant 0 : index
    %c0_0 = arith.constant 0 : index
    %c1 = arith.constant 1 : index
    %c1_1 = arith.constant 1 : index
    %0 = vector.load %arg3[%c0, %c0_0, %c1, %c1_1] : memref<1x3x64x64xf32, #tpu.memory_space<vmem>>, vector<1x1x63x63xf32>
    %1 = vector.shape_cast %0 : vector<1x1x63x63xf32> to vector<63x63xf32>
    %c0_2 = arith.constant 0 : index
    %c1_3 = arith.constant 1 : index
    %c1_4 = arith.constant 1 : index
    %c1_5 = arith.constant 1 : index
    %2 = vector.load %arg3[%c0_2, %c1_3, %c1_4, %c1_5] : memref<1x3x64x64xf32, #tpu.memory_space<vmem>>, vector<1x1x63x63xf32>
    %3 = vector.shape_cast %2 : vector<1x1x63x63xf32> to vector<63x63xf32>
    %c0_6 = arith.constant 0 : index
    %c2 = arith.constant 2 : index
    %c1_7 = arith.constant 1 : index
    %c1_8 = arith.constant 1 : index
    %4 = vector.load %arg3[%c0_6, %c2, %c1_7, %c1_8] : memref<1x3x64x64xf32, #tpu.memory_space<vmem>>, vector<1x1x63x63xf32>
    %5 = vector.shape_cast %4 : vector<1x1x63x63xf32> to vector<63x63xf32>
    %c0_9 = arith.constant 0 : index
    %6 = memref.load %arg1[%c0_9] : memref<24xf32, #tpu.memory_space<smem>>
    %7 = vector.broadcast %6 : f32 to vector<63x63xf32>
    %8 = arith.mulf %1, %7 : vector<63x63xf32>
    %c1_10 = arith.constant 1 : index
    %9 = memref.load %arg1[%c1_10] : memref<24xf32, #tpu.memory_space<smem>>
    %10 = vector.broadcast %9 : f32 to vector<63x63xf32>
    %11 = arith.mulf %3, %10 : vector<63x63xf32>
    %12 = arith.addf %8, %11 : vector<63x63xf32>
    %c2_11 = arith.constant 2 : index
    %13 = memref.load %arg1[%c2_11] : memref<24xf32, #tpu.memory_space<smem>>
    %14 = vector.broadcast %13 : f32 to vector<63x63xf32>
    %15 = arith.mulf %5, %14 : vector<63x63xf32>
    %16 = arith.addf %12, %15 : vector<63x63xf32>
    %c0_12 = arith.constant 0 : index
    %17 = memref.load %arg2[%c0_12] : memref<8xf32, #tpu.memory_space<smem>>
    %18 = vector.broadcast %17 : f32 to vector<63x63xf32>
    %19 = arith.addf %16, %18 : vector<63x63xf32>
    %cst = arith.constant 0.000000e+00 : f32
    %20 = vector.broadcast %cst : f32 to vector<63x63xf32>
    %21 = arith.maximumf %19, %20 : vector<63x63xf32>
    %c0_13 = arith.constant 0 : index
    %c0_14 = arith.constant 0 : index
    %c0_15 = arith.constant 0 : index
    %c0_16 = arith.constant 0 : index
    %22 = vector.load %arg4[%c0_13, %c0_14, %c0_15, %c0_16] : memref<1x8x63x63xf32, #tpu.memory_space<vmem>>, vector<1x1x63x63xf32>
    %23 = vector.shape_cast %22 : vector<1x1x63x63xf32> to vector<63x63xf32>
    %24 = vector.shape_cast %21 : vector<63x63xf32> to vector<1x1x63x63xf32>
    tpu.vector_store %arg4[%c0_13, %c0_14, %c0_15, %c0_16], %24 {strides = array<i32>} : memref<1x8x63x63xf32, #tpu.memory_space<vmem>>, vector<1x1x63x63xf32>,
    %c3 = arith.constant 3 : index
    %25 = memref.load %arg1[%c3] : memref<24xf32, #tpu.memory_space<smem>>
    %26 = vector.broadcast %25 : f32 to vector<63x63xf32>
    %27 = arith.mulf %1, %26 : vector<63x63xf32>
    %c4 = arith.constant 4 : index
    %28 = memref.load %arg1[%c4] : memref<24xf32, #tpu.memory_space<smem>>
    %29 = vector.broadcast %28 : f32 to vector<63x63xf32>
    %30 = arith.mulf %3, %29 : vector<63x63xf32>
    %31 = arith.addf %27, %30 : vector<63x63xf32>
    %c5 = arith.constant 5 : index
    %32 = memref.load %arg1[%c5] : memref<24xf32, #tpu.memory_space<smem>>
    %33 = vector.broadcast %32 : f32 to vector<63x63xf32>
    %34 = arith.mulf %5, %33 : vector<63x63xf32>
    %35 = arith.addf %31, %34 : vector<63x63xf32>
    %c1_17 = arith.constant 1 : index
    %36 = memref.load %arg2[%c1_17] : memref<8xf32, #tpu.memory_space<smem>>
    %37 = vector.broadcast %36 : f32 to vector<63x63xf32>
    %38 = arith.addf %35, %37 : vector<63x63xf32>
    %cst_18 = arith.constant 0.000000e+00 : f32
    %39 = vector.broadcast %cst_18 : f32 to vector<63x63xf32>
    %40 = arith.maximumf %38, %39 : vector<63x63xf32>
    %c0_19 = arith.constant 0 : index
    %c1_20 = arith.constant 1 : index
    %c0_21 = arith.constant 0 : index
    %c0_22 = arith.constant 0 : index
    %41 = vector.load %arg4[%c0_19, %c1_20, %c0_21, %c0_22] : memref<1x8x63x63xf32, #tpu.memory_space<vmem>>, vector<1x1x63x63xf32>
    %42 = vector.shape_cast %41 : vector<1x1x63x63xf32> to vector<63x63xf32>
    %43 = vector.shape_cast %40 : vector<63x63xf32> to vector<1x1x63x63xf32>
    tpu.vector_store %arg4[%c0_19, %c1_20, %c0_21, %c0_22], %43 {strides = array<i32>} : memref<1x8x63x63xf32, #tpu.memory_space<vmem>>, vector<1x1x63x63xf32>,
    %c6 = arith.constant 6 : index
    %44 = memref.load %arg1[%c6] : memref<24xf32, #tpu.memory_space<smem>>
    %45 = vector.broadcast %44 : f32 to vector<63x63xf32>
    %46 = arith.mulf %1, %45 : vector<63x63xf32>
    %c7 = arith.constant 7 : index
    %47 = memref.load %arg1[%c7] : memref<24xf32, #tpu.memory_space<smem>>
    %48 = vector.broadcast %47 : f32 to vector<63x63xf32>
    %49 = arith.mulf %3, %48 : vector<63x63xf32>
    %50 = arith.addf %46, %49 : vector<63x63xf32>
    %c8 = arith.constant 8 : index
    %51 = memref.load %arg1[%c8] : memref<24xf32, #tpu.memory_space<smem>>
    %52 = vector.broadcast %51 : f32 to vector<63x63xf32>
    %53 = arith.mulf %5, %52 : vector<63x63xf32>
    %54 = arith.addf %50, %53 : vector<63x63xf32>
    %c2_23 = arith.constant 2 : index
    %55 = memref.load %arg2[%c2_23] : memref<8xf32, #tpu.memory_space<smem>>
    %56 = vector.broadcast %55 : f32 to vector<63x63xf32>
    %57 = arith.addf %54, %56 : vector<63x63xf32>
    %cst_24 = arith.constant 0.000000e+00 : f32
    %58 = vector.broadcast %cst_24 : f32 to vector<63x63xf32>
    %59 = arith.maximumf %57, %58 : vector<63x63xf32>
    %c0_25 = arith.constant 0 : index
    %c2_26 = arith.constant 2 : index
    %c0_27 = arith.constant 0 : index
    %c0_28 = arith.constant 0 : index
    %60 = vector.load %arg4[%c0_25, %c2_26, %c0_27, %c0_28] : memref<1x8x63x63xf32, #tpu.memory_space<vmem>>, vector<1x1x63x63xf32>
    %61 = vector.shape_cast %60 : vector<1x1x63x63xf32> to vector<63x63xf32>
    %62 = vector.shape_cast %59 : vector<63x63xf32> to vector<1x1x63x63xf32>
    tpu.vector_store %arg4[%c0_25, %c2_26, %c0_27, %c0_28], %62 {strides = array<i32>} : memref<1x8x63x63xf32, #tpu.memory_space<vmem>>, vector<1x1x63x63xf32>,
    %c9 = arith.constant 9 : index
    %63 = memref.load %arg1[%c9] : memref<24xf32, #tpu.memory_space<smem>>
    %64 = vector.broadcast %63 : f32 to vector<63x63xf32>
    %65 = arith.mulf %1, %64 : vector<63x63xf32>
    %c10 = arith.constant 10 : index
    %66 = memref.load %arg1[%c10] : memref<24xf32, #tpu.memory_space<smem>>
    %67 = vector.broadcast %66 : f32 to vector<63x63xf32>
    %68 = arith.mulf %3, %67 : vector<63x63xf32>
    %69 = arith.addf %65, %68 : vector<63x63xf32>
    %c11 = arith.constant 11 : index
    %70 = memref.load %arg1[%c11] : memref<24xf32, #tpu.memory_space<smem>>
    %71 = vector.broadcast %70 : f32 to vector<63x63xf32>
    %72 = arith.mulf %5, %71 : vector<63x63xf32>
    %73 = arith.addf %69, %72 : vector<63x63xf32>
    %c3_29 = arith.constant 3 : index
    %74 = memref.load %arg2[%c3_29] : memref<8xf32, #tpu.memory_space<smem>>
    %75 = vector.broadcast %74 : f32 to vector<63x63xf32>
    %76 = arith.addf %73, %75 : vector<63x63xf32>
    %cst_30 = arith.constant 0.000000e+00 : f32
    %77 = vector.broadcast %cst_30 : f32 to vector<63x63xf32>
    %78 = arith.maximumf %76, %77 : vector<63x63xf32>
    %c0_31 = arith.constant 0 : index
    %c3_32 = arith.constant 3 : index
    %c0_33 = arith.constant 0 : index
    %c0_34 = arith.constant 0 : index
    %79 = vector.load %arg4[%c0_31, %c3_32, %c0_33, %c0_34] : memref<1x8x63x63xf32, #tpu.memory_space<vmem>>, vector<1x1x63x63xf32>
    %80 = vector.shape_cast %79 : vector<1x1x63x63xf32> to vector<63x63xf32>
    %81 = vector.shape_cast %78 : vector<63x63xf32> to vector<1x1x63x63xf32>
    tpu.vector_store %arg4[%c0_31, %c3_32, %c0_33, %c0_34], %81 {strides = array<i32>} : memref<1x8x63x63xf32, #tpu.memory_space<vmem>>, vector<1x1x63x63xf32>,
    %c12 = arith.constant 12 : index
    %82 = memref.load %arg1[%c12] : memref<24xf32, #tpu.memory_space<smem>>
    %83 = vector.broadcast %82 : f32 to vector<63x63xf32>
    %84 = arith.mulf %1, %83 : vector<63x63xf32>
    %c13 = arith.constant 13 : index
    %85 = memref.load %arg1[%c13] : memref<24xf32, #tpu.memory_space<smem>>
    %86 = vector.broadcast %85 : f32 to vector<63x63xf32>
    %87 = arith.mulf %3, %86 : vector<63x63xf32>
    %88 = arith.addf %84, %87 : vector<63x63xf32>
    %c14 = arith.constant 14 : index
    %89 = memref.load %arg1[%c14] : memref<24xf32, #tpu.memory_space<smem>>
    %90 = vector.broadcast %89 : f32 to vector<63x63xf32>
    %91 = arith.mulf %5, %90 : vector<63x63xf32>
    %92 = arith.addf %88, %91 : vector<63x63xf32>
    %c4_35 = arith.constant 4 : index
    %93 = memref.load %arg2[%c4_35] : memref<8xf32, #tpu.memory_space<smem>>
    %94 = vector.broadcast %93 : f32 to vector<63x63xf32>
    %95 = arith.addf %92, %94 : vector<63x63xf32>
    %cst_36 = arith.constant 0.000000e+00 : f32
    %96 = vector.broadcast %cst_36 : f32 to vector<63x63xf32>
    %97 = arith.maximumf %95, %96 : vector<63x63xf32>
    %c0_37 = arith.constant 0 : index
    %c4_38 = arith.constant 4 : index
    %c0_39 = arith.constant 0 : index
    %c0_40 = arith.constant 0 : index
    %98 = vector.load %arg4[%c0_37, %c4_38, %c0_39, %c0_40] : memref<1x8x63x63xf32, #tpu.memory_space<vmem>>, vector<1x1x63x63xf32>
    %99 = vector.shape_cast %98 : vector<1x1x63x63xf32> to vector<63x63xf32>
    %100 = vector.shape_cast %97 : vector<63x63xf32> to vector<1x1x63x63xf32>
    tpu.vector_store %arg4[%c0_37, %c4_38, %c0_39, %c0_40], %100 {strides = array<i32>} : memref<1x8x63x63xf32, #tpu.memory_space<vmem>>, vector<1x1x63x63xf32>,
    %c15 = arith.constant 15 : index
    %101 = memref.load %arg1[%c15] : memref<24xf32, #tpu.memory_space<smem>>
    %102 = vector.broadcast %101 : f32 to vector<63x63xf32>
    %103 = arith.mulf %1, %102 : vector<63x63xf32>
    %c16 = arith.constant 16 : index
    %104 = memref.load %arg1[%c16] : memref<24xf32, #tpu.memory_space<smem>>
    %105 = vector.broadcast %104 : f32 to vector<63x63xf32>
    %106 = arith.mulf %3, %105 : vector<63x63xf32>
    %107 = arith.addf %103, %106 : vector<63x63xf32>
    %c17 = arith.constant 17 : index
    %108 = memref.load %arg1[%c17] : memref<24xf32, #tpu.memory_space<smem>>
    %109 = vector.broadcast %108 : f32 to vector<63x63xf32>
    %110 = arith.mulf %5, %109 : vector<63x63xf32>
    %111 = arith.addf %107, %110 : vector<63x63xf32>
    %c5_41 = arith.constant 5 : index
    %112 = memref.load %arg2[%c5_41] : memref<8xf32, #tpu.memory_space<smem>>
    %113 = vector.broadcast %112 : f32 to vector<63x63xf32>
    %114 = arith.addf %111, %113 : vector<63x63xf32>
    %cst_42 = arith.constant 0.000000e+00 : f32
    %115 = vector.broadcast %cst_42 : f32 to vector<63x63xf32>
    %116 = arith.maximumf %114, %115 : vector<63x63xf32>
    %c0_43 = arith.constant 0 : index
    %c5_44 = arith.constant 5 : index
    %c0_45 = arith.constant 0 : index
    %c0_46 = arith.constant 0 : index
    %117 = vector.load %arg4[%c0_43, %c5_44, %c0_45, %c0_46] : memref<1x8x63x63xf32, #tpu.memory_space<vmem>>, vector<1x1x63x63xf32>
    %118 = vector.shape_cast %117 : vector<1x1x63x63xf32> to vector<63x63xf32>
    %119 = vector.shape_cast %116 : vector<63x63xf32> to vector<1x1x63x63xf32>
    tpu.vector_store %arg4[%c0_43, %c5_44, %c0_45, %c0_46], %119 {strides = array<i32>} : memref<1x8x63x63xf32, #tpu.memory_space<vmem>>, vector<1x1x63x63xf32>,
    %c18 = arith.constant 18 : index
    %120 = memref.load %arg1[%c18] : memref<24xf32, #tpu.memory_space<smem>>
    %121 = vector.broadcast %120 : f32 to vector<63x63xf32>
    %122 = arith.mulf %1, %121 : vector<63x63xf32>
    %c19 = arith.constant 19 : index
    %123 = memref.load %arg1[%c19] : memref<24xf32, #tpu.memory_space<smem>>
    %124 = vector.broadcast %123 : f32 to vector<63x63xf32>
    %125 = arith.mulf %3, %124 : vector<63x63xf32>
    %126 = arith.addf %122, %125 : vector<63x63xf32>
    %c20 = arith.constant 20 : index
    %127 = memref.load %arg1[%c20] : memref<24xf32, #tpu.memory_space<smem>>
    %128 = vector.broadcast %127 : f32 to vector<63x63xf32>
    %129 = arith.mulf %5, %128 : vector<63x63xf32>
    %130 = arith.addf %126, %129 : vector<63x63xf32>
    %c6_47 = arith.constant 6 : index
    %131 = memref.load %arg2[%c6_47] : memref<8xf32, #tpu.memory_space<smem>>
    %132 = vector.broadcast %131 : f32 to vector<63x63xf32>
    %133 = arith.addf %130, %132 : vector<63x63xf32>
    %cst_48 = arith.constant 0.000000e+00 : f32
    %134 = vector.broadcast %cst_48 : f32 to vector<63x63xf32>
    %135 = arith.maximumf %133, %134 : vector<63x63xf32>
    %c0_49 = arith.constant 0 : index
    %c6_50 = arith.constant 6 : index
    %c0_51 = arith.constant 0 : index
    %c0_52 = arith.constant 0 : index
    %136 = vector.load %arg4[%c0_49, %c6_50, %c0_51, %c0_52] : memref<1x8x63x63xf32, #tpu.memory_space<vmem>>, vector<1x1x63x63xf32>
    %137 = vector.shape_cast %136 : vector<1x1x63x63xf32> to vector<63x63xf32>
    %138 = vector.shape_cast %135 : vector<63x63xf32> to vector<1x1x63x63xf32>
    tpu.vector_store %arg4[%c0_49, %c6_50, %c0_51, %c0_52], %138 {strides = array<i32>} : memref<1x8x63x63xf32, #tpu.memory_space<vmem>>, vector<1x1x63x63xf32>,
    %c21 = arith.constant 21 : index
    %139 = memref.load %arg1[%c21] : memref<24xf32, #tpu.memory_space<smem>>
    %140 = vector.broadcast %139 : f32 to vector<63x63xf32>
    %141 = arith.mulf %1, %140 : vector<63x63xf32>
    %c22 = arith.constant 22 : index
    %142 = memref.load %arg1[%c22] : memref<24xf32, #tpu.memory_space<smem>>
    %143 = vector.broadcast %142 : f32 to vector<63x63xf32>
    %144 = arith.mulf %3, %143 : vector<63x63xf32>
    %145 = arith.addf %141, %144 : vector<63x63xf32>
    %c23 = arith.constant 23 : index
    %146 = memref.load %arg1[%c23] : memref<24xf32, #tpu.memory_space<smem>>
    %147 = vector.broadcast %146 : f32 to vector<63x63xf32>
    %148 = arith.mulf %5, %147 : vector<63x63xf32>
    %149 = arith.addf %145, %148 : vector<63x63xf32>
    %c7_53 = arith.constant 7 : index
    %150 = memref.load %arg2[%c7_53] : memref<8xf32, #tpu.memory_space<smem>>
    %151 = vector.broadcast %150 : f32 to vector<63x63xf32>
    %152 = arith.addf %149, %151 : vector<63x63xf32>
    %cst_54 = arith.constant 0.000000e+00 : f32
    %153 = vector.broadcast %cst_54 : f32 to vector<63x63xf32>
    %154 = arith.maximumf %152, %153 : vector<63x63xf32>
    %c0_55 = arith.constant 0 : index
    %c7_56 = arith.constant 7 : index
    %c0_57 = arith.constant 0 : index
    %c0_58 = arith.constant 0 : index
    %155 = vector.load %arg4[%c0_55, %c7_56, %c0_57, %c0_58] : memref<1x8x63x63xf32, #tpu.memory_space<vmem>>, vector<1x1x63x63xf32>
    %156 = vector.shape_cast %155 : vector<1x1x63x63xf32> to vector<63x63xf32>
    %157 = vector.shape_cast %154 : vector<63x63xf32> to vector<1x1x63x63xf32>
    tpu.vector_store %arg4[%c0_55, %c7_56, %c0_57, %c0_58], %157 {strides = array<i32>} : memref<1x8x63x63xf32, #tpu.memory_space<vmem>>, vector<1x1x63x63xf32>,
    return
  }
  func.func @transform_0(%arg0: i32, %arg1: memref<24xf32, #tpu.memory_space<smem>>, %arg2: memref<8xf32, #tpu.memory_space<smem>>) -> (i32, i32, i32, i32) {
    %c0_i32 = arith.constant 0 : i32
    %c0_i32_0 = arith.constant 0 : i32
    %c0_i32_1 = arith.constant 0 : i32
    %c0_i32_2 = arith.constant 0 : i32
    return %arg0, %c0_i32, %c0_i32_0, %c0_i32_1 : i32, i32, i32, i32
  }
  func.func @transform_1(%arg0: i32, %arg1: memref<24xf32, #tpu.memory_space<smem>>, %arg2: memref<8xf32, #tpu.memory_space<smem>>) -> (i32, i32, i32, i32) {
    %c0_i32 = arith.constant 0 : i32
    %c0_i32_0 = arith.constant 0 : i32
    %c0_i32_1 = arith.constant 0 : i32
    %c0_i32_2 = arith.constant 0 : i32
    return %arg0, %c0_i32, %c0_i32_0, %c0_i32_1 : i32, i32, i32, i32
  }
}

</mosaic_0001>

<bundles_post_ra>
// kernel: tpu_custom_call.1
= control target key start
LH: loop header
LB: loop body
LE: loop exit
PB: predicated region body
PF: predicated region fallthrough
CT: control target
= control target key end

     0   :  { %s1073_s18 = smov [#allocation3]   ;;  %s1074_s19 = smov [#allocation4]   ;;  %s2006_s0 = inlined_call_operand.hbm [shape: f32[24], index: 0, kind: input, shape index: {}]   ;;  %s2007_s2 = inlined_call_operand.hbm [shape: f32[1,3,64,64], index: 2, kind: input, shape index: {}]   ;;  %s2008_s3 = inlined_call_operand.vmem [shape: f32[1,8,63,63], index: 3, kind: output, shape index: {}]   ;;  %s2009_s1 = inlined_call_operand.hbm [shape: f32[8], index: 1, kind: input, shape index: {}]  }
   0x1   :  { %s9_s14 = sshll.u32 %s2006_s0, 4  ;;  %s14_s17 = sshll.u32 %s2009_s1, 4  ;;  %s10_s14 = int_to_ptr.hbm [resolvable:$true] %s9_s14  ;;  %s15_s17 = int_to_ptr.hbm [resolvable:$true] %s14_s17 }
   0x2   :  { %12 = dma.hbm_to_smem %s10_s14, 16, %s1073_s18, [#allocation2] }
   0x3   :  { %17 = dma.hbm_to_smem %s15_s17, 16, %s1074_s19, [#allocation2] }
   0x4   :  { %1069 = dma.done.wait [#allocation2], 32 }
   0x5   :  { %1070 = vsyncadd [#allocation2], 4294967264 }
   0x6   :  { %20 = sfence }
   0x7   :  { %21 = vsyncpa [#allocation6], 0  ;;  %s26_s22 = sshll.u32 %s2007_s2, 4  ;;  %s1075_s0 = smov [#allocation5]   ;;  %s27_s22 = int_to_ptr.hbm [resolvable:$true] %s26_s22 }
   0x8   :  { %s28_s23 = sshll.u32 %s1075_s0, 4  ;;  %s1076_s24 = smov 128   ;;  %s29_s23 = int_to_ptr.vmem [resolvable:$true] %s28_s23 }
   0x9   :  { %s1077_s1 = smov 8  }
   0xa   :  { %34 = dma.hbm_to_vmem [thread:$0]  %s27_s22, 3072, %s29_s23, [#allocation6], %s1076_s24, %s1076_s24, %s1077_s1  }
   0xb   :  { %1071 = dma.done.wait [#allocation6], 3072  }
   0xc   :  { %1072 = vsyncadd [#allocation6], 4294964224  ;;  %s65_s25 = sld [smem:[#allocation3]]  ;;  %v1110_v0 = vld [vmem:[#allocation5 + $0x1] sm:$0xff]  ;;  %v1122_v6 = vld [vmem:[#allocation5 + $0x11] sm:$0xff]  ;;  %s1078_s4 = smov 127  }
   0xd   :  { %s911_s26 = sld [smem:[#allocation3 + $0x1]]  ;;  %v1112_v1 = vld [vmem:[#allocation5 + $0x41] sm:$0xff]  ;;  %v1124_v7 = vld [vmem:[#allocation5 + $0x51] sm:$0xff]  ;;  %v1136_v13 = vld [vmem:[#allocation5 + $0x9] sm:$0xff]  ;;  %vm161_vm0 = vcmask 515072   ;;  %vm169_vm1 = vcmask 514048  }
   0xe   :  { %s912_s27 = sld [smem:[#allocation3 + $0x2]]  ;;  %v1114_v2 = vld [vmem:[#allocation5 + $0x81] sm:$0xff]  ;;  %v1126_v8 = vld [vmem:[#allocation5 + $0x91] sm:$0xff]  ;;  %v1138_v14 = vld [vmem:[#allocation5 + $0x49] sm:$0xff] }
   0xf   :  { %s1108_s28 = sld [smem:[#allocation4]]  ;;  %v1140_v15 = vld [vmem:[#allocation5 + $0x89] sm:$0xff]  ;;  %v1150_v19 = vld [vmem:[#allocation5 + $0x19] sm:$0xff]  ;;  %v1162_v26 = vld [vmem:[#allocation5 + $0x31] sm:$0xff] }
  0x10   :  { %s1142_s2 = sld [smem:[#allocation3 + $0x3]]  ;;  %v1152_v20 = vld [vmem:[#allocation5 + $0x59] sm:$0xff]  ;;  %v1164_v27 = vld [vmem:[#allocation5 + $0x71] sm:$0xff]  ;;  %v1201_v55 = vld [vmem:[#allocation5 + $0x21] sm:$0xff] }
  0x11   :  { %v1154_v21 = vld [vmem:[#allocation5 + $0x99] sm:$0xff]  ;;  %s1156_s29 = sld [smem:[#allocation3 + $0x4]]  ;;  %v1189_v45 = vld [vmem:[#allocation5 + $0xb1] sm:$0xff]  ;;  %v1203_v56 = vld [vmem:[#allocation5 + $0x61] sm:$0xff] }
  0x12   :  { %v1116_v3 = vstv %s65_s25  ;;  %v1175_v32 = vld [vmem:[#allocation5 + $0x39] sm:$0x7f]  ;;  %s915_s30 = sld [smem:[#allocation3 + $0x5]]  ;;  %v1211_v60 = vld [vmem:[#allocation5 + $0xa1] sm:$0xff] }
  0x13   :  { %v67_v4 = vmul.f32 %v1116_v3, %v1110_v0  ;;  %v1120_v5 = vstv %s911_s26  ;;  %v69_v11 = vmul.f32 %v1116_v3, %v1122_v6  ;;  %v68_v18 = vmul.f32 %v1116_v3, %v1136_v13  ;;  %v1177_v33 = vld [vmem:[#allocation5 + $0x79] sm:$0x7f]  ;;  %s1217_s5 = sld [smem:[#allocation4 + $0x1]] }
  0x14   :  { %v77_v9 = vmul.f32 %v1120_v5, %v1112_v1  ;;  %v1130_v10 = vstv %s912_s27  ;;  %v79_v12 = vmul.f32 %v1120_v5, %v1124_v7  ;;  %v78_v24 = vmul.f32 %v1120_v5, %v1138_v14  ;;  %v1191_v47 = vld [vmem:[#allocation5 + $0xb9] sm:$0x7f]  ;;  %s1248_s6 = sld [smem:[#allocation3 + $0x6]] }
  0x15   :  { %v95_v16 = vmul.f32 %v1130_v10, %v1114_v2  ;;  %v97_v17 = vmul.f32 %v1130_v10, %v1126_v8  ;;  %v96_v25 = vmul.f32 %v1130_v10, %v1140_v15  ;;  %v1167_v28 = vstv %s1108_s28  ;;  %s926_s7 = sld [smem:[#allocation3 + $0x7]] }
  0x16   :  { %v85_v22 = vadd.f32 %v77_v9, %v67_v4  ;;  %v87_v23 = vadd.f32 %v79_v12, %v69_v11  ;;  %v70_v29 = vmul.f32 %v1116_v3, %v1150_v19  ;;  %v80_v30 = vmul.f32 %v1120_v5, %v1152_v20  ;;  %v1225_v11 = vld [vmem:[#allocation5 + $0x29] sm:$0xff]  ;;  %s927_s8 = sld [smem:[#allocation3 + $0x8]] }
  0x17   :  { %v98_v31 = vmul.f32 %v1130_v10, %v1154_v21  ;;  %v86_v36 = vadd.f32 %v78_v24, %v68_v18  ;;  %v73_v37 = vmul.f32 %v1116_v3, %v1162_v26  ;;  %v83_v39 = vmul.f32 %v1120_v5, %v1164_v27  ;;  %s928_s9 = sld [smem:[#allocation4 + $0x2]] }
  0x18   :  { %v103_v34 = vadd.f32 %v95_v16, %v85_v22  ;;  %v105_v35 = vadd.f32 %v97_v17, %v87_v23  ;;  %v88_v38 = vadd.f32 %v80_v30, %v70_v29  ;;  %v74_v40 = vmul.f32 %v1116_v3, %v1175_v32  ;;  %v1233_v22 = vld [vmem:[#allocation5 + $0x69] sm:$0xff]  ;;  %s937_s10 = sld [smem:[#allocation3 + $0x9]] }
  0x19   :  { %v84_v41 = vmul.f32 %v1120_v5, %v1177_v33  ;;  %v104_v44 = vadd.f32 %v96_v25, %v86_v36  ;;  %v1194_v50 = vstv %s1142_s2  ;;  %v91_v51 = vadd.f32 %v83_v39, %v73_v37  ;;  %v1235_v23 = vld [vmem:[#allocation5 + $0xa9] sm:$0xff]  ;;  %s938_s11 = sld [smem:[#allocation3 + $0xa]] }
  0x1a   :  { %v113_v42 = vadd.f32 %v1167_v28, %v103_v34  ;;  %v115_v43 = vadd.f32 %v1167_v28, %v105_v35  ;;  %v106_v46 = vadd.f32 %v98_v31, %v88_v38  ;;  %v101_v52 = vmul.f32 %v1130_v10, %v1189_v45  ;;  %s939_s12 = sld [smem:[#allocation3 + $0xb]] }
  0x1b   :  { %v92_v53 = vadd.f32 %v84_v41, %v74_v40  ;;  %v1199_v54 = vstv %s1156_s29  ;;  %v114_v57 = vadd.f32 %v1167_v28, %v104_v44  ;;  %v102_v59 = vmul.f32 %v1130_v10, %v1191_v47  ;;  %s940_s13 = sld [smem:[#allocation4 + $0x3]] }
  0x1c   :  { %v121_v48 = vmax.f32 %v113_v42, 0.0  ;;  %v123_v49 = vmax.f32 %v115_v43, 0.0  ;;  %v116_v58 = vadd.f32 %v1167_v28, %v106_v46  ;;  %v174_v61 = vmul.f32 %v1194_v50, %v1136_v13  ;;  %s949_s14 = sld [smem:[#allocation3 + $0xc]] }
  0x1d   :  { %v184_v62 = vmul.f32 %v1199_v54, %v1138_v14  ;;  %v1219_v63 = vstv %s915_s30  ;;  %v71_v4 = vmul.f32 %v1116_v3, %v1201_v55  ;;  %v81_v9 = vmul.f32 %v1120_v5, %v1203_v56  ;;  %s950_s15 = sld [smem:[#allocation3 + $0xd]] }
  0x1e   :  { %137 = vrot.lane.b32.xlu0 %v121_v48, %s1078_s4  ;;  %141 = vrot.lane.b32.xlu1 %v123_v49, %s1078_s4  ;;  %v109_v12 = vadd.f32 %v101_v52, %v91_v51  ;;  %v99_v16 = vmul.f32 %v1130_v10, %v1211_v60  ;;  %v175_v17 = vmul.f32 %v1194_v50, %v1122_v6  ;;  %v122_v24 = vmax.f32 %v114_v57, 0.0  ;;  %s951_s16 = sld [smem:[#allocation3 + $0xe]] }
  0x1f   :  { %v185_v18 = vmul.f32 %v1199_v54, %v1124_v7  ;;  %v124_v25 = vmax.f32 %v116_v58, 0.0  ;;  %v110_v29 = vadd.f32 %v102_v59, %v92_v53  ;;  %v89_v30 = vadd.f32 %v81_v9, %v71_v4  ;;  %s952_s17 = sld [smem:[#allocation4 + $0x4]] }
  0x20   :  { %v192_v31 = vadd.f32 %v184_v62, %v174_v61  ;;  %v202_v34 = vmul.f32 %v1219_v63, %v1140_v15  ;;  %v203_v35 = vmul.f32 %v1219_v63, %v1126_v8  ;;  %v72_v36 = vmul.f32 %v1116_v3, %v1225_v11  ;;  %s961_s18 = sld [smem:[#allocation3 + $0xf]] }
  0x21   :  { %v107_v37 = vadd.f32 %v99_v16, %v89_v30  ;;  %v193_v38 = vadd.f32 %v185_v18, %v175_v17  ;;  %v82_v39 = vmul.f32 %v1120_v5, %v1233_v22  ;;  %v100_v40 = vmul.f32 %v1130_v10, %v1235_v23  ;;  %s962_s19 = sld [smem:[#allocation3 + $0x10]] }
  0x22   :  { %v119_v41 = vadd.f32 %v1167_v28, %v109_v12  ;;  %v120_v42 = vadd.f32 %v1167_v28, %v110_v29  ;;  %v210_v44 = vadd.f32 %v202_v34, %v192_v31  ;;  %v1255_v46 = vstv %s1217_s5  ;;  %s963_s20 = sld [smem:[#allocation3 + $0x11]] }
  0x23   :  { %v117_v3 = vadd.f32 %v1167_v28, %v107_v37  ;;  %v90_v43 = vadd.f32 %v82_v39, %v72_v36  ;;  %v177_v5 = vmul.f32 %v1194_v50, %v1201_v55  ;;  %v211_v48 = vadd.f32 %v203_v35, %v193_v38  ;;  %s964_s21 = sld [smem:[#allocation4 + $0x5]] }
  0x24   :  { %v187_v49 = vmul.f32 %v1199_v54, %v1203_v56  ;;  %v178_v52 = vmul.f32 %v1194_v50, %v1225_v11  ;;  %v188_v53 = vmul.f32 %v1199_v54, %v1233_v22  ;;  %v127_v57 = vmax.f32 %v119_v41, 0.0  ;;  %s1550_s22 = sld [smem:[#allocation3 + $0x12]] }
  0x25   :  { %v125_v10 = vmax.f32 %v117_v3, 0.0  ;;  %v108_v51 = vadd.f32 %v100_v40, %v90_v43  ;;  %v128_v58 = vmax.f32 %v120_v42, 0.0  ;;  %v220_v61 = vadd.f32 %v1255_v46, %v210_v44  ;;  %s1554_s0 = sld [smem:[#allocation3 + $0x13]] }
  0x26   :  { %139 = vrot.lane.b32.xlu0 %v122_v24, %s1078_s4  ;;  %143 = vrot.lane.b32.xlu1 %v124_v25, %s1078_s4  ;;  %v221_v62 = vadd.f32 %v1255_v46, %v211_v48  ;;  %v195_v4 = vadd.f32 %v187_v49, %v177_v5  ;;  %v205_v9 = vmul.f32 %v1219_v63, %v1211_v60  ;;  %v1280_v24 = vstv %s1248_s6  ;;  %s975_s23 = sld [smem:[#allocation3 + $0x14]] }
  0x27   :  { %145 = vrot.lane.b32.xlu2 %v125_v10, %s1078_s4  ;;  %v118_v59 = vadd.f32 %v1167_v28, %v108_v51  ;;  %v196_v12 = vadd.f32 %v188_v53, %v178_v52  ;;  %v206_v16 = vmul.f32 %v1219_v63, %v1235_v23  ;;  %v173_v17 = vmul.f32 %v1194_v50, %v1110_v0  ;;  %s1602_s25 = sld [smem:[#allocation4 + $0x6]] }
  0x28   :  { %v183_v18 = vmul.f32 %v1199_v54, %v1112_v1  ;;  %v1282_v25 = vstv %s926_s7  ;;  %v201_v29 = vmul.f32 %v1219_v63, %v1114_v2  ;;  %v228_v30 = vmax.f32 %v220_v61, 0.0  ;;  %s1655_s5 = sld [smem:[#allocation3 + $0x15]] }
  0x29   :  { %v126_v28 = vmax.f32 %v118_v59, 0.0  ;;  %v229_v34 = vmax.f32 %v221_v62, 0.0  ;;  %v213_v35 = vadd.f32 %v205_v9, %v195_v4  ;;  %v180_v36 = vmul.f32 %v1194_v50, %v1175_v32 }
  0x2a   :  { %v191_v31 = vadd.f32 %v183_v18, %v173_v17  ;;  %v190_v37 = vmul.f32 %v1199_v54, %v1177_v33  ;;  %v278_v38 = vmul.f32 %v1280_v24, %v1110_v0  ;;  %v288_v39 = vmul.f32 %v1282_v25, %v1112_v1 }
  0x2b   :  { %v176_v41 = vmul.f32 %v1194_v50, %v1150_v19  ;;  %v214_v42 = vadd.f32 %v206_v16, %v196_v12  ;;  %v1297_v3 = vstv %s927_s8  ;;  %v186_v43 = vmul.f32 %v1199_v54, %v1152_v20  ;;  %s1663_s8 = sld [smem:[#allocation3 + $0x16]] }
  0x2c   :  { %v209_v40 = vadd.f32 %v201_v29, %v191_v31  ;;  %v204_v44 = vmul.f32 %v1219_v63, %v1154_v21  ;;  %v208_v10 = vmul.f32 %v1219_v63, %v1191_v47  ;;  %v223_v49 = vadd.f32 %v1255_v46, %v213_v35 }
  0x2d   :  { %v194_v48 = vadd.f32 %v186_v43, %v176_v41  ;;  %v198_v51 = vadd.f32 %v190_v37, %v180_v36  ;;  %v296_v52 = vadd.f32 %v288_v39, %v278_v38  ;;  %v306_v53 = vmul.f32 %v1297_v3, %v1114_v2 }
  0x2e   :  { %149 = vrot.lane.b32.xlu0 %v127_v57, %s1078_s4  ;;  %151 = vrot.lane.b32.xlu1 %v128_v58, %s1078_s4  ;;  %v219_v5 = vadd.f32 %v1255_v46, %v209_v40  ;;  %v224_v57 = vadd.f32 %v1255_v46, %v214_v42  ;;  %v280_v61 = vmul.f32 %v1280_v24, %v1122_v6  ;;  %v231_v17 = vmax.f32 %v223_v49, 0.0 }
  0x2f   :  { %147 = vrot.lane.b32.xlu2 %v126_v28, %s1078_s4  ;;  %v212_v59 = vadd.f32 %v204_v44, %v194_v48  ;;  %v290_v62 = vmul.f32 %v1282_v25, %v1124_v7  ;;  %v179_v4 = vmul.f32 %v1194_v50, %v1162_v26  ;;  %v281_v9 = vmul.f32 %v1280_v24, %v1150_v19 }
  0x30   :  { %v227_v58 = vmax.f32 %v219_v5, 0.0  ;;  %v291_v12 = vmul.f32 %v1282_v25, %v1152_v20  ;;  %v189_v16 = vmul.f32 %v1199_v54, %v1164_v27  ;;  %v216_v18 = vadd.f32 %v208_v10, %v198_v51 }
  0x31   :  { %v314_v28 = vadd.f32 %v306_v53, %v296_v52  ;;  %v1324_v29 = vstv %s928_s9  ;;  %v222_v31 = vadd.f32 %v1255_v46, %v212_v59  ;;  %v298_v35 = vadd.f32 %v290_v62, %v280_v61 }
  0x32   :  { %v197_v50 = vadd.f32 %v189_v16, %v179_v4  ;;  %v308_v36 = vmul.f32 %v1297_v3, %v1126_v8  ;;  %v299_v37 = vadd.f32 %v291_v12, %v281_v9  ;;  %v309_v54 = vmul.f32 %v1297_v3, %v1154_v21 }
  0x33   :  { %v226_v38 = vadd.f32 %v1255_v46, %v216_v18  ;;  %v324_v39 = vadd.f32 %v1324_v29, %v314_v28  ;;  %v230_v40 = vmax.f32 %v222_v31, 0.0  ;;  %v279_v41 = vmul.f32 %v1280_v24, %v1136_v13 }
  0x34   :  { %v289_v42 = vmul.f32 %v1282_v25, %v1138_v14  ;;  %v316_v43 = vadd.f32 %v308_v36, %v298_v35  ;;  %v283_v44 = vmul.f32 %v1280_v24, %v1225_v11  ;;  %v317_v5 = vadd.f32 %v309_v54, %v299_v37 }
  0x35   :  { %v293_v10 = vmul.f32 %v1282_v25, %v1233_v22  ;;  %v284_v48 = vmul.f32 %v1280_v24, %v1162_v26  ;;  %v294_v49 = vmul.f32 %v1282_v25, %v1164_v27  ;;  %v234_v51 = vmax.f32 %v226_v38, 0.0 }
  0x36   :  { %245 = vrot.lane.b32.xlu0 %v228_v30, %s1078_s4  ;;  %247 = vrot.lane.b32.xlu1 %v229_v34, %s1078_s4  ;;  %v232_v30 = vmax.f32 %v224_v57, 0.0  ;;  %v207_v34 = vmul.f32 %v1219_v63, %v1189_v45  ;;  %v332_v52 = vmax.f32 %v324_v39, 0.0  ;;  %v297_v57 = vadd.f32 %v289_v42, %v279_v41 }
  0x37   :  { %243 = vrot.lane.b32.xlu2 %v227_v58, %s1078_s4  ;;  %v307_v58 = vmul.f32 %v1297_v3, %v1140_v15  ;;  %v326_v59 = vadd.f32 %v1324_v29, %v316_v43  ;;  %v311_v61 = vmul.f32 %v1297_v3, %v1235_v23  ;;  %v327_v62 = vadd.f32 %v1324_v29, %v317_v5 }
  0x38   :  { %v215_v63 = vadd.f32 %v207_v34, %v197_v50  ;;  %v301_v4 = vadd.f32 %v293_v10, %v283_v44  ;;  %v302_v9 = vadd.f32 %v294_v49, %v284_v48  ;;  %v312_v12 = vmul.f32 %v1297_v3, %v1189_v45 }
  0x39   :  { %v1360_v16 = vstv %s937_s10  ;;  %v315_v18 = vadd.f32 %v307_v58, %v297_v57  ;;  %v282_v28 = vmul.f32 %v1280_v24, %v1201_v55  ;;  %v334_v31 = vmax.f32 %v326_v59, 0.0 }
  0x3a   :  { %v225_v53 = vadd.f32 %v1255_v46, %v215_v63  ;;  %v1362_v46 = vstv %s938_s11  ;;  %v335_v50 = vmax.f32 %v327_v62, 0.0  ;;  %v319_v34 = vadd.f32 %v311_v61, %v301_v4  ;;  %s1683_s11 = sld [smem:[#allocation3 + $0x17]] }
  0x3b   :  { %v320_v35 = vadd.f32 %v312_v12, %v302_v9  ;;  %v383_v36 = vmul.f32 %v1360_v16, %v1110_v0  ;;  %v393_v37 = vmul.f32 %v1362_v46, %v1112_v1  ;;  %v384_v54 = vmul.f32 %v1360_v16, %v1136_v13 }
  0x3c   :  { %v394_v38 = vmul.f32 %v1362_v46, %v1138_v14  ;;  %v1379_v39 = vstv %s939_s12  ;;  %v310_v41 = vmul.f32 %v1297_v3, %v1211_v60  ;;  %v329_v42 = vadd.f32 %v1324_v29, %v319_v34 }
  0x3d   :  { %v330_v43 = vadd.f32 %v1324_v29, %v320_v35  ;;  %v401_v44 = vadd.f32 %v393_v37, %v383_v36  ;;  %v411_v5 = vmul.f32 %v1379_v39, %v1114_v2  ;;  %v412_v48 = vmul.f32 %v1379_v39, %v1140_v15 }
  0x3e   :  { %251 = vrot.lane.b32.xlu0 %v231_v17, %s1078_s4  ;;  %253 = vrot.lane.b32.xlu1 %v232_v30, %s1078_s4  ;;  %v233_v17 = vmax.f32 %v225_v53, 0.0  ;;  %v292_v30 = vmul.f32 %v1282_v25, %v1203_v56  ;;  %v402_v10 = vadd.f32 %v394_v38, %v384_v54  ;;  %v295_v53 = vmul.f32 %v1282_v25, %v1177_v33 }
  0x3f   :  { %249 = vrot.lane.b32.xlu2 %v230_v40, %s1078_s4  ;;  %v325_v40 = vadd.f32 %v1324_v29, %v315_v18  ;;  %v386_v57 = vmul.f32 %v1360_v16, %v1150_v19  ;;  %v396_v58 = vmul.f32 %v1362_v46, %v1152_v20  ;;  %v387_v59 = vmul.f32 %v1360_v16, %v1201_v55 }
  0x40   :  { %v300_v63 = vadd.f32 %v292_v30, %v282_v28  ;;  %v397_v61 = vmul.f32 %v1362_v46, %v1203_v56  ;;  %v337_v62 = vmax.f32 %v329_v42, 0.0  ;;  %v419_v4 = vadd.f32 %v411_v5, %v401_v44 }
  0x41   :  { %v333_v49 = vmax.f32 %v325_v40, 0.0  ;;  %v1404_v9 = vstv %s940_s13  ;;  %v338_v12 = vmax.f32 %v330_v43, 0.0  ;;  %v313_v18 = vmul.f32 %v1297_v3, %v1191_v47 }
  0x42   :  { %v404_v28 = vadd.f32 %v396_v58, %v386_v57  ;;  %v414_v30 = vmul.f32 %v1379_v39, %v1154_v21  ;;  %v429_v34 = vadd.f32 %v1404_v9, %v419_v4  ;;  %v385_v37 = vmul.f32 %v1360_v16, %v1122_v6 }
  0x43   :  { %v395_v54 = vmul.f32 %v1362_v46, %v1124_v7  ;;  %v390_v43 = vmul.f32 %v1360_v16, %v1175_v32  ;;  %v400_v44 = vmul.f32 %v1362_v46, %v1177_v33  ;;  %v417_v57 = vmul.f32 %v1379_v39, %v1189_v45 }
  0x44   :  { %v422_v38 = vadd.f32 %v414_v30, %v404_v28  ;;  %v437_v42 = vmax.f32 %v429_v34, 0.0  ;;  %v1458_v34 = vstv %s951_s16  ;;  %s1717_s16 = sld [smem:[#allocation4 + $0x7]] }
  0x45   :  { %v408_v58 = vadd.f32 %v400_v44, %v390_v43 }
  0x46   :  { %257 = vrot.lane.b32.xlu0 %v234_v51, %s1078_s4  ;;  %348 = vrot.lane.b32.xlu1 %v332_v52, %s1078_s4  ;;  %v318_v51 = vadd.f32 %v310_v41, %v300_v63  ;;  %v285_v52 = vmul.f32 %v1280_v24, %v1175_v32  ;;  %v420_v24 = vadd.f32 %v412_v48, %v402_v10 }
  0x47   :  { %255 = vrot.lane.b32.xlu2 %v233_v17, %s1078_s4  ;;  %v389_v63 = vmul.f32 %v1360_v16, %v1162_v26  ;;  %v399_v41 = vmul.f32 %v1362_v46, %v1164_v27  ;;  %v403_v48 = vadd.f32 %v395_v54, %v385_v37  ;;  %v517_v37 = vmul.f32 %v1458_v34, %v1140_v15 }
  0x48   :  { %v328_v25 = vadd.f32 %v1324_v29, %v318_v51  ;;  %v303_v17 = vadd.f32 %v295_v53, %v285_v52  ;;  %v430_v35 = vadd.f32 %v1404_v9, %v420_v24  ;;  %v432_v51 = vadd.f32 %v1404_v9, %v422_v38 }
  0x49   :  { %v407_v53 = vadd.f32 %v399_v41, %v389_v63  ;;  %v388_v24 = vmul.f32 %v1360_v16, %v1225_v11  ;;  %v518_v38 = vmul.f32 %v1458_v34, %v1126_v8 }
  0x4a   :  { %v336_v36 = vmax.f32 %v328_v25, 0.0  ;;  %v321_v3 = vadd.f32 %v313_v18, %v303_v17  ;;  %v438_v5 = vmax.f32 %v430_v35, 0.0  ;;  %v440_v30 = vmax.f32 %v432_v51, 0.0 }
  0x4b   :  { %v1480_v51 = vstv %s952_s17 }
  0x4c   :  { %v331_v10 = vadd.f32 %v1324_v29, %v321_v3 }
  0x4e   :  { %352 = vrot.lane.b32.xlu0 %v334_v31, %s1078_s4  ;;  %354 = vrot.lane.b32.xlu1 %v335_v50, %s1078_s4  ;;  %v405_v31 = vadd.f32 %v397_v61, %v387_v59  ;;  %v415_v50 = vmul.f32 %v1379_v39, %v1211_v60  ;;  %v418_v59 = vmul.f32 %v1379_v39, %v1191_v47  ;;  %v1440_v61 = vstv %s949_s14 }
  0x4f   :  { %350 = vrot.lane.b32.xlu2 %v333_v49, %s1078_s4  ;;  %v413_v49 = vmul.f32 %v1379_v39, %v1126_v8  ;;  %v339_v29 = vmax.f32 %v331_v10, 0.0  ;;  %v489_v25 = vmul.f32 %v1440_v61, %v1136_v13  ;;  %v490_v18 = vmul.f32 %v1440_v61, %v1122_v6 }
  0x50   :  { %v423_v40 = vadd.f32 %v415_v50, %v405_v31  ;;  %v425_v31 = vadd.f32 %v417_v57, %v407_v53  ;;  %v426_v50 = vadd.f32 %v418_v59, %v408_v58  ;;  %v492_v10 = vmul.f32 %v1440_v61, %v1201_v55 }
  0x51   :  { %v421_v4 = vadd.f32 %v413_v49, %v403_v48 }
  0x52   :  { %v433_v52 = vadd.f32 %v1404_v9, %v423_v40  ;;  %v435_v40 = vadd.f32 %v1404_v9, %v425_v31  ;;  %v436_v63 = vadd.f32 %v1404_v9, %v426_v50  ;;  %v491_v50 = vmul.f32 %v1440_v61, %v1150_v19 }
  0x54   :  { %v441_v16 = vmax.f32 %v433_v52, 0.0  ;;  %v443_v49 = vmax.f32 %v435_v40, 0.0  ;;  %v493_v52 = vmul.f32 %v1440_v61, %v1225_v11  ;;  %v444_v57 = vmax.f32 %v436_v63, 0.0 }
  0x55   :  { %v1515_v63 = vstv %s963_s20 }
  0x56   :  { %358 = vrot.lane.b32.xlu0 %v337_v62, %s1078_s4  ;;  %360 = vrot.lane.b32.xlu1 %v338_v12, %s1078_s4  ;;  %v1442_v62 = vstv %s950_s15  ;;  %v398_v12 = vmul.f32 %v1362_v46, %v1233_v22  ;;  %v431_v46 = vadd.f32 %v1404_v9, %v421_v4 }
  0x57   :  { %356 = vrot.lane.b32.xlu2 %v336_v36, %s1078_s4  ;;  %v499_v17 = vmul.f32 %v1442_v62, %v1138_v14  ;;  %v500_v28 = vmul.f32 %v1442_v62, %v1124_v7  ;;  %v416_v36 = vmul.f32 %v1379_v39, %v1235_v23  ;;  %v498_v43 = vmul.f32 %v1442_v62, %v1112_v1 }
  0x58   :  { %v406_v35 = vadd.f32 %v398_v12, %v388_v24  ;;  %v439_v41 = vmax.f32 %v431_v46, 0.0  ;;  %v502_v48 = vmul.f32 %v1442_v62, %v1203_v56  ;;  %v503_v53 = vmul.f32 %v1442_v62, %v1233_v22 }
  0x59   :  { %v507_v3 = vadd.f32 %v499_v17, %v489_v25  ;;  %v508_v54 = vadd.f32 %v500_v28, %v490_v18  ;;  %v520_v25 = vmul.f32 %v1458_v34, %v1211_v60  ;;  %v521_v18 = vmul.f32 %v1458_v34, %v1235_v23 }
  0x5a   :  { %v424_v39 = vadd.f32 %v416_v36, %v406_v35  ;;  %v510_v12 = vadd.f32 %v502_v48, %v492_v10  ;;  %v511_v17 = vadd.f32 %v503_v53, %v493_v52  ;;  %v1496_v28 = vstv %s961_s18 }
  0x5b   :  { %v525_v44 = vadd.f32 %v517_v37, %v507_v3  ;;  %v495_v3 = vmul.f32 %v1440_v61, %v1175_v32 }
  0x5c   :  { %v434_v58 = vadd.f32 %v1404_v9, %v424_v39  ;;  %v1498_v9 = vstv %s962_s19  ;;  %v528_v36 = vadd.f32 %v520_v25, %v510_v12  ;;  %v529_v37 = vadd.f32 %v521_v18, %v511_v17 }
  0x5d   :  { %v535_v4 = vadd.f32 %v1480_v51, %v525_v44  ;;  %v603_v40 = vmul.f32 %v1498_v9, %v1112_v1  ;;  %v523_v44 = vmul.f32 %v1458_v34, %v1191_v47 }
  0x5e   :  { %453 = vrot.lane.b32.xlu0 %v437_v42, %s1078_s4  ;;  %455 = vrot.lane.b32.xlu1 %v438_v5, %s1078_s4  ;;  %v488_v42 = vmul.f32 %v1440_v61, %v1110_v0  ;;  %v526_v5 = vadd.f32 %v518_v38, %v508_v54  ;;  %v505_v54 = vmul.f32 %v1442_v62, %v1177_v33 }
  0x5f   :  { %362 = vrot.lane.b32.xlu2 %v339_v29, %s1078_s4  ;;  %v516_v29 = vmul.f32 %v1458_v34, %v1114_v2  ;;  %v543_v46 = vmax.f32 %v535_v4, 0.0  ;;  %v593_v38 = vmul.f32 %v1496_v28, %v1110_v0  ;;  %v596_v4 = vmul.f32 %v1496_v28, %v1150_v19 }
  0x60   :  { %v506_v59 = vadd.f32 %v498_v43, %v488_v42  ;;  %v536_v24 = vadd.f32 %v1480_v51, %v526_v5  ;;  %v519_v42 = vmul.f32 %v1458_v34, %v1154_v21  ;;  %v538_v43 = vadd.f32 %v1480_v51, %v528_v36 }
  0x61   :  { %v539_v5 = vadd.f32 %v1480_v51, %v529_v37  ;;  %v513_v10 = vadd.f32 %v505_v54, %v495_v3  ;;  %v611_v48 = vadd.f32 %v603_v40, %v593_v38  ;;  %v594_v54 = vmul.f32 %v1496_v28, %v1136_v13 }
  0x62   :  { %v524_v31 = vadd.f32 %v516_v29, %v506_v59  ;;  %v544_v35 = vmax.f32 %v536_v24, 0.0  ;;  %v595_v59 = vmul.f32 %v1496_v28, %v1122_v6  ;;  %v605_v29 = vmul.f32 %v1498_v9, %v1124_v7 }
  0x63   :  { %v606_v24 = vmul.f32 %v1498_v9, %v1152_v20  ;;  %v546_v12 = vmax.f32 %v538_v43, 0.0  ;;  %v547_v25 = vmax.f32 %v539_v5, 0.0  ;;  %v531_v17 = vadd.f32 %v523_v44, %v513_v10 }
  0x64   :  { %v604_v38 = vmul.f32 %v1498_v9, %v1138_v14  ;;  %v599_v44 = vmul.f32 %v1496_v28, %v1162_v26  ;;  %v609_v5 = vmul.f32 %v1498_v9, %v1164_v27 }
  0x65   :  { %v541_v36 = vadd.f32 %v1480_v51, %v531_v17 }
  0x66   :  { %459 = vrot.lane.b32.xlu0 %v440_v30, %s1078_s4  ;;  %461 = vrot.lane.b32.xlu1 %v441_v16, %s1078_s4  ;;  %v442_v30 = vmax.f32 %v434_v58, 0.0  ;;  %v501_v16 = vmul.f32 %v1442_v62, %v1152_v20  ;;  %v504_v58 = vmul.f32 %v1442_v62, %v1164_v27 }
  0x67   :  { %457 = vrot.lane.b32.xlu2 %v439_v41, %s1078_s4  ;;  %v534_v41 = vadd.f32 %v1480_v51, %v524_v31  ;;  %v522_v31 = vmul.f32 %v1458_v34, %v1189_v45  ;;  %v549_v43 = vmax.f32 %v541_v36, 0.0 }
  0x68   :  { %v509_v39 = vadd.f32 %v501_v16, %v491_v50  ;;  %v613_v50 = vadd.f32 %v605_v29, %v595_v59  ;;  %v623_v16 = vmul.f32 %v1515_v63, %v1126_v8  ;;  %v626_v59 = vmul.f32 %v1515_v63, %v1235_v23 }
  0x69   :  { %v542_v52 = vmax.f32 %v534_v41, 0.0 }
  0x6a   :  { %v527_v53 = vadd.f32 %v519_v42, %v509_v39  ;;  %v631_v40 = vadd.f32 %v623_v16, %v613_v50  ;;  %v598_v39 = vmul.f32 %v1496_v28, %v1225_v11  ;;  %v608_v42 = vmul.f32 %v1498_v9, %v1233_v22 }
  0x6b   :  { %v1598_v16 = vstv %s975_s23 }
  0x6c   :  { %v537_v62 = vadd.f32 %v1480_v51, %v527_v53 }
  0x6e   :  { %465 = vrot.lane.b32.xlu0 %v443_v49, %s1078_s4  ;;  %467 = vrot.lane.b32.xlu1 %v444_v57, %s1078_s4  ;;  %v621_v49 = vmul.f32 %v1515_v63, %v1114_v2  ;;  %v494_v57 = vmul.f32 %v1440_v61, %v1162_v26  ;;  %v1540_v61 = vstv %s964_s21  ;;  %v545_v34 = vmax.f32 %v537_v62, 0.0 }
  0x6f   :  { %463 = vrot.lane.b32.xlu2 %v442_v30, %s1078_s4  ;;  %v641_v53 = vadd.f32 %v1540_v61, %v631_v40  ;;  %v607_v62 = vmul.f32 %v1498_v9, %v1203_v56 }
  0x70   :  { %v629_v18 = vadd.f32 %v621_v49, %v611_v48  ;;  %v512_v30 = vadd.f32 %v504_v58, %v494_v57  ;;  %v612_v49 = vadd.f32 %v604_v38, %v594_v54  ;;  %v616_v58 = vadd.f32 %v608_v42, %v598_v39 }
  0x71   :  { %v625_v54 = vmul.f32 %v1515_v63, %v1211_v60  ;;  %v727_v39 = vmul.f32 %v1598_v16, %v1140_v15 }
  0x72   :  { %v639_v3 = vadd.f32 %v1540_v61, %v629_v18  ;;  %v530_v37 = vadd.f32 %v522_v31, %v512_v30  ;;  %v597_v18 = vmul.f32 %v1496_v28, %v1201_v55  ;;  %v649_v30 = vmax.f32 %v641_v53, 0.0 }
  0x73   :  { %v634_v31 = vadd.f32 %v626_v59, %v616_v58  ;;  %v1641_v53 = vstv %s1602_s25  ;;  %v628_v59 = vmul.f32 %v1515_v63, %v1191_v47 }
  0x74   :  { %v647_v10 = vmax.f32 %v639_v3, 0.0  ;;  %v540_v48 = vadd.f32 %v1480_v51, %v530_v37  ;;  %v617_v51 = vadd.f32 %v609_v5, %v599_v44  ;;  %v610_v44 = vmul.f32 %v1498_v9, %v1177_v33 }
  0x75   :  { %v644_v38 = vadd.f32 %v1540_v61, %v634_v31 }
  0x76   :  { %560 = vrot.lane.b32.xlu0 %v543_v46, %s1078_s4  ;;  %562 = vrot.lane.b32.xlu1 %v544_v35, %s1078_s4  ;;  %v614_v46 = vadd.f32 %v606_v24, %v596_v4  ;;  %v624_v35 = vmul.f32 %v1515_v63, %v1154_v21  ;;  %v627_v4 = vmul.f32 %v1515_v63, %v1189_v45  ;;  %v1585_v24 = vstv %s1550_s22 }
  0x77   :  { %558 = vrot.lane.b32.xlu2 %v542_v52, %s1078_s4  ;;  %v622_v52 = vmul.f32 %v1515_v63, %v1140_v15  ;;  %v698_v50 = vmul.f32 %v1585_v24, %v1110_v0  ;;  %v699_v36 = vmul.f32 %v1585_v24, %v1136_v13  ;;  %v615_v0 = vadd.f32 %v607_v62, %v597_v18 }
  0x78   :  { %v632_v41 = vadd.f32 %v624_v35, %v614_v46  ;;  %v635_v46 = vadd.f32 %v627_v4, %v617_v51  ;;  %v729_v51 = vmul.f32 %v1598_v16, %v1154_v21 }
  0x79   :  { %v630_v17 = vadd.f32 %v622_v52, %v612_v49  ;;  %v702_v49 = vmul.f32 %v1585_v24, %v1201_v55 }
  0x7a   :  { %v642_v57 = vadd.f32 %v1540_v61, %v632_v41  ;;  %v645_v13 = vadd.f32 %v1540_v61, %v635_v46 }
  0x7b   :  { %v640_v37 = vadd.f32 %v1540_v61, %v630_v17  ;;  %v730_v17 = vmul.f32 %v1598_v16, %v1211_v60 }
  0x7d   :  { %v648_v42 = vmax.f32 %v640_v37, 0.0 }
  0x7e   :  { %566 = vrot.lane.b32.xlu0 %v546_v12, %s1078_s4  ;;  %568 = vrot.lane.b32.xlu1 %v547_v25, %s1078_s4  ;;  %v1588_v12 = vstv %s1554_s0  ;;  %v548_v25 = vmax.f32 %v540_v48, 0.0  ;;  %v701_v48 = vmul.f32 %v1585_v24, %v1150_v19  ;;  %v653_v19 = vmax.f32 %v645_v13, 0.0 }
  0x7f   :  { %564 = vrot.lane.b32.xlu2 %v545_v34, %s1078_s4  ;;  %v708_v35 = vmul.f32 %v1588_v12, %v1112_v1  ;;  %v709_v3 = vmul.f32 %v1588_v12, %v1138_v14  ;;  %v650_v34 = vmax.f32 %v642_v57, 0.0  ;;  %v726_v1 = vmul.f32 %v1598_v16, %v1114_v2 }
  0x80   :  { %v633_v2 = vadd.f32 %v625_v54, %v615_v0  ;;  %v711_v15 = vmul.f32 %v1588_v12, %v1152_v20  ;;  %v712_v52 = vmul.f32 %v1588_v12, %v1203_v56  ;;  %v710_v31 = vmul.f32 %v1588_v12, %v1124_v7 }
  0x81   :  { %v146_v29 = vpop.permute.xlu2 %145  ;;  %v716_v41 = vadd.f32 %v708_v35, %v698_v50  ;;  %v717_v14 = vadd.f32 %v709_v3, %v699_v36  ;;  %v704_v3 = vmul.f32 %v1585_v24, %v1162_v26  ;;  %v715_v7 = vmul.f32 %v1588_v12, %v1177_v33 }
  0x82   :  { %166 = vst.msk [vmem:[%s2008_s3 + $0x20] sm:$0xff] %vm161_vm0, %v146_v29  ;;  %v643_v20 = vadd.f32 %v1540_v61, %v633_v2  ;;  %v719_v29 = vadd.f32 %v711_v15, %v701_v48  ;;  %v1004_v48 = vld [vmem:[#allocation5 + $0x49] sm:$0xff] }
  0x83   :  { %v734_v9 = vadd.f32 %v726_v1, %v716_v41  ;;  %v735_v57 = vadd.f32 %v727_v39, %v717_v14  ;;  %v732_v1 = vmul.f32 %v1598_v16, %v1189_v45  ;;  %v1704_v41 = vstv %s1655_s5 }
  0x84   :  { %v651_v21 = vmax.f32 %v643_v20, 0.0  ;;  %v737_v35 = vadd.f32 %v729_v51, %v719_v29  ;;  %v703_v39 = vmul.f32 %v1585_v24, %v1225_v11  ;;  %v1007_v51 = vld [vmem:[#allocation5 + $0x89] sm:$0xff] }
  0x85   :  { %v744_v18 = vadd.f32 %v1641_v53, %v734_v9  ;;  %v745_v62 = vadd.f32 %v1641_v53, %v735_v57 }
  0x86   :  { %572 = vrot.lane.b32.xlu0 %v549_v43, %s1078_s4  ;;  %663 = vrot.lane.b32.xlu1 %v647_v10, %s1078_s4  ;;  %v600_v43 = vmul.f32 %v1496_v28, %v1175_v32  ;;  %v652_v28 = vmax.f32 %v644_v38, 0.0  ;;  %v747_v33 = vadd.f32 %v1641_v53, %v737_v35 }
  0x87   :  { %570 = vrot.lane.b32.xlu2 %v548_v25, %s1078_s4  ;;  %v720_v25 = vadd.f32 %v712_v52, %v702_v49  ;;  %v752_v37 = vmax.f32 %v744_v18, 0.0  ;;  %v753_v26 = vmax.f32 %v745_v62, 0.0  ;;  %v1005_v49 = vld [vmem:[#allocation5 + $0x11] sm:$0xff] }
  0x88   :  { %v618_v58 = vadd.f32 %v610_v44, %v600_v43  ;;  %v805_v52 = vmul.f32 %v1005_v49, %v1704_v41  ;;  %v1008_v62 = vld [vmem:[#allocation5 + $0x91] sm:$0xff] }
  0x89   :  { %v148_v40 = vpop.permute.xlu2 %147  ;;  %v738_v36 = vadd.f32 %v730_v17, %v720_v25 }
  0x8a   :  { %167 = vst.msk [vmem:[%s2008_s3 + $0x28] sm:$0xff] %vm161_vm0, %v148_v40  ;;  %v636_v63 = vadd.f32 %v628_v59, %v618_v58  ;;  %v731_v58 = vmul.f32 %v1598_v16, %v1235_v23 }
  0x8b   :  { %v748_v54 = vadd.f32 %v1641_v53, %v738_v36 }
  0x8d   :  { %v756_v57 = vmax.f32 %v748_v54, 0.0  ;;  %v1011_v54 = vld [vmem:[#allocation5 + $0x81] sm:$0xff] }
  0x8e   :  { %667 = vrot.lane.b32.xlu0 %v649_v30, %s1078_s4  ;;  %669 = vrot.lane.b32.xlu1 %v650_v34, %s1078_s4  ;;  %v700_v30 = vmul.f32 %v1585_v24, %v1122_v6  ;;  %v714_v34 = vmul.f32 %v1588_v12, %v1164_v27  ;;  %v705_v6 = vmul.f32 %v1585_v24, %v1175_v32 }
  0x8f   :  { %665 = vrot.lane.b32.xlu2 %v648_v42, %s1078_s4  ;;  %v646_v27 = vadd.f32 %v1540_v61, %v636_v63  ;;  %v728_v32 = vmul.f32 %v1598_v16, %v1126_v8  ;;  %v733_v61 = vmul.f32 %v1598_v16, %v1191_v47  ;;  %v1707_v8 = vstv %s1663_s8 }
  0x90   :  { %v138_v5 = vpop.permute.xlu0 %137  ;;  %v142_v10 = vpop.permute.xlu1 %141  ;;  %v718_v0 = vadd.f32 %v710_v31, %v700_v30  ;;  %v722_v38 = vadd.f32 %v714_v34, %v704_v3  ;;  %v723_v13 = vadd.f32 %v715_v7, %v705_v6  ;;  %v713_v42 = vmul.f32 %v1588_v12, %v1233_v22  ;;  %v1009_v30 = vld [vmem:[#allocation5 + $0x1] sm:$0xff] }
  0x91   :  { %162 = vst.msk [vmem:[%s2008_s3] sm:$0xff] %vm161_vm0, %v138_v5  ;;  %v244_v4 = vpop.permute.xlu2 %243  ;;  %v654_v14 = vmax.f32 %v646_v27, 0.0  ;;  %v755_v47 = vmax.f32 %v747_v33, 0.0  ;;  %v1003_v5 = vld [vmem:[#allocation5 + $0x9] sm:$0xff]  ;;  %v814_v15 = vmul.f32 %v1004_v48, %v1707_v8  ;;  %v1724_v12 = vstv %s1683_s11  ;;  %v1015_v48 = vld [vmem:[#allocation5 + $0x79] sm:$0x7f] }
  0x92   :  { %164 = vst.msk [vmem:[%s2008_s3 + $0x10] sm:$0xff] %vm161_vm0, %v142_v10  ;;  %v736_v45 = vadd.f32 %v728_v32, %v718_v0  ;;  %v740_v44 = vadd.f32 %v732_v1, %v722_v38  ;;  %v804_v10 = vmul.f32 %v1003_v5, %v1704_v41  ;;  %v741_v24 = vadd.f32 %v733_v61, %v723_v13  ;;  %v1014_v5 = vld [vmem:[#allocation5 + $0x39] sm:$0x7f] }
  0x93   :  { %917 = vst.msk [vmem:[%s2008_s3 + $0x40] sm:$0xff] %vm161_vm0, %v244_v4  ;;  %v721_v20 = vadd.f32 %v713_v42, %v703_v39  ;;  %v832_v4 = vmul.f32 %v1007_v51, %v1724_v12  ;;  %v803_v31 = vmul.f32 %v1009_v30, %v1704_v41  ;;  %v807_v6 = vmul.f32 %v1704_v41, %v1201_v55  ;;  %v1013_v39 = vld [vmem:[#allocation5 + $0x59] sm:$0xff] }
  0x94   :  { %v750_v59 = vadd.f32 %v1641_v53, %v740_v44  ;;  %v822_v29 = vadd.f32 %v814_v15, %v804_v10  ;;  %v751_v17 = vadd.f32 %v1641_v53, %v741_v24  ;;  %v808_v27 = vmul.f32 %v1704_v41, %v1225_v11 }
  0x95   :  { %v739_v63 = vadd.f32 %v731_v58, %v721_v20  ;;  %v818_v0 = vmul.f32 %v1707_v8, %v1233_v22  ;;  %v835_v11 = vmul.f32 %v1724_v12, %v1211_v60  ;;  %v1012_v60 = vld [vmem:[#allocation5 + $0x19] sm:$0xff]  ;;  %v816_v42 = vmul.f32 %v1013_v39, %v1707_v8 }
  0x96   :  { %673 = vrot.lane.b32.xlu0 %v652_v28, %s1078_s4  ;;  %675 = vrot.lane.b32.xlu1 %v653_v19, %s1078_s4  ;;  %v1006_v28 = vld [vmem:[#allocation5 + $0x51] sm:$0xff]  ;;  %v746_v19 = vadd.f32 %v1641_v53, %v736_v45  ;;  %v758_v36 = vmax.f32 %v750_v59, 0.0  ;;  %v840_v34 = vadd.f32 %v832_v4, %v822_v29  ;;  %v759_v55 = vmax.f32 %v751_v17, 0.0  ;;  %v1017_v59 = vld [vmem:[#allocation5 + $0xb9] sm:$0x7f] }
  0x97   :  { %671 = vrot.lane.b32.xlu2 %v651_v21, %s1078_s4  ;;  %v815_v9 = vmul.f32 %v1006_v28, %v1707_v8  ;;  %v833_v21 = vmul.f32 %v1008_v62, %v1724_v12  ;;  %v749_v32 = vadd.f32 %v1641_v53, %v739_v63  ;;  %v826_v13 = vadd.f32 %v818_v0, %v808_v27  ;;  %v1016_v28 = vld [vmem:[#allocation5 + $0x99] sm:$0xff] }
  0x98   :  { %v140_v50 = vpop.permute.xlu0 %139  ;;  %v144_v46 = vpop.permute.xlu1 %143  ;;  %v754_v16 = vmax.f32 %v746_v19, 0.0  ;;  %v836_v53 = vmul.f32 %v1724_v12, %v1235_v23  ;;  %v806_v45 = vmul.f32 %v1012_v60, %v1704_v41  ;;  %v810_v10 = vmul.f32 %v1014_v5, %v1704_v41 }
  0x99   :  { %163 = vst.msk [vmem:[%s2008_s3 + $0x8] sm:$0xff] %vm161_vm0, %v140_v50  ;;  %v250_v40 = vpop.permute.xlu2 %249  ;;  %v823_v18 = vadd.f32 %v815_v9, %v805_v52  ;;  %v1010_v50 = vld [vmem:[#allocation5 + $0x41] sm:$0xff]  ;;  %v757_v61 = vmax.f32 %v749_v32, 0.0  ;;  %v820_v15 = vmul.f32 %v1015_v48, %v1707_v8  ;;  %v834_v9 = vmul.f32 %v1016_v28, %v1724_v12 }
  0x9a   :  { %165 = vst.msk [vmem:[%s2008_s3 + $0x18] sm:$0xff] %vm161_vm0, %v144_v46  ;;  %v813_v46 = vmul.f32 %v1010_v50, %v1707_v8  ;;  %v844_v44 = vadd.f32 %v836_v53, %v826_v13  ;;  %v824_v52 = vadd.f32 %v816_v42, %v806_v45  ;;  %v838_v29 = vmul.f32 %v1017_v59, %v1724_v12  ;;  %v1020_v50 = vld [vmem:[#allocation5 + $0xb1] sm:$0xff] }
  0x9b   :  { %920 = vst.msk [vmem:[%s2008_s3 + $0x58] sm:$0xff] %vm161_vm0, %v250_v40  ;;  %v841_v7 = vadd.f32 %v833_v21, %v823_v18  ;;  %v828_v58 = vadd.f32 %v820_v15, %v810_v10  ;;  %v1019_v18 = vld [vmem:[#allocation5 + $0x71] sm:$0xff] }
  0x9c   :  { %v821_v33 = vadd.f32 %v813_v46, %v803_v31  ;;  %v842_v4 = vadd.f32 %v834_v9, %v824_v52  ;;  %v819_v62 = vmul.f32 %v1019_v18, %v1707_v8  ;;  %v837_v46 = vmul.f32 %v1020_v50, %v1724_v12 }
  0x9d   :  { %v846_v30 = vadd.f32 %v838_v29, %v828_v58 }
  0x9e   :  { %768 = vrot.lane.b32.xlu0 %v752_v37, %s1078_s4  ;;  %770 = vrot.lane.b32.xlu1 %v753_v26, %s1078_s4  ;;  %v1749_v37 = vstv %s1717_s16  ;;  %v817_v26 = vmul.f32 %v1707_v8, %v1203_v56  ;;  %v831_v56 = vmul.f32 %v1011_v54, %v1724_v12 }
  0x9f   :  { %677 = vrot.lane.b32.xlu2 %v654_v14, %s1078_s4  ;;  %v850_v38 = vadd.f32 %v1749_v37, %v840_v34  ;;  %v851_v1 = vadd.f32 %v1749_v37, %v841_v7  ;;  %v854_v20 = vadd.f32 %v1749_v37, %v844_v44 }
  0xa0   :  { %v150_v2 = vpop.permute.xlu0 %149  ;;  %v152_v43 = vpop.permute.xlu1 %151  ;;  %v825_v40 = vadd.f32 %v817_v26, %v807_v6  ;;  %v839_v14 = vadd.f32 %v831_v56, %v821_v33 }
  0xa1   :  { %168 = vst.msk [vmem:[%s2008_s3 + $0x30] sm:$0xff] %vm161_vm0, %v150_v2  ;;  %v256_v25 = vpop.permute.xlu2 %255  ;;  %v859_v24 = vmax.f32 %v851_v1, 0.0  ;;  %v862_v31 = vmax.f32 %v854_v20, 0.0 }
  0xa2   :  { %170 = vst.msk [vmem:[%s2008_s3 + $0x38] sm:$0x7f] %vm169_vm1, %v152_v43  ;;  %v843_v23 = vadd.f32 %v835_v11, %v825_v40  ;;  %v849_v49 = vadd.f32 %v1749_v37, %v839_v14 }
  0xa3   :  { %923 = vst.msk [vmem:[%s2008_s3 + $0x70] sm:$0xff] %vm161_vm0, %v256_v25  ;;  %v1018_v25 = vld [vmem:[#allocation5 + $0x31] sm:$0xff] }
  0xa4   :  { %v853_v19 = vadd.f32 %v1749_v37, %v843_v23  ;;  %v857_v51 = vmax.f32 %v849_v49, 0.0  ;;  %v809_v17 = vmul.f32 %v1018_v25, %v1704_v41  ;;  %v852_v41 = vadd.f32 %v1749_v37, %v842_v4 }
  0xa6   :  { %774 = vrot.lane.b32.xlu0 %v755_v47, %s1078_s4  ;;  %776 = vrot.lane.b32.xlu1 %v756_v57, %s1078_s4  ;;  %v858_v47 = vmax.f32 %v850_v38, 0.0  ;;  %v861_v63 = vmax.f32 %v853_v19, 0.0  ;;  %v827_v8 = vadd.f32 %v819_v62, %v809_v17 }
  0xa7   :  { %772 = vrot.lane.b32.xlu2 %v754_v16, %s1078_s4 }
  0xa8   :  { %v246_v35 = vpop.permute.xlu0 %245  ;;  %v248_v3 = vpop.permute.xlu1 %247  ;;  %v845_v34 = vadd.f32 %v837_v46, %v827_v8 }
  0xa9   :  { %918 = vst.msk [vmem:[%s2008_s3 + $0x48] sm:$0xff] %vm161_vm0, %v246_v35  ;;  %v351_v22 = vpop.permute.xlu2 %350 }
  0xaa   :  { %919 = vst.msk [vmem:[%s2008_s3 + $0x50] sm:$0xff] %vm161_vm0, %v248_v3  ;;  %v860_v3 = vmax.f32 %v852_v41, 0.0  ;;  %v855_v26 = vadd.f32 %v1749_v37, %v845_v34 }
  0xab   :  { %930 = vst.msk [vmem:[%s2008_s3 + $0x88] sm:$0xff] %vm161_vm0, %v351_v22 }
  0xac   :  { %v863_v0 = vmax.f32 %v855_v26, 0.0 }
  0xae   :  { %780 = vrot.lane.b32.xlu0 %v758_v36, %s1078_s4  ;;  %782 = vrot.lane.b32.xlu1 %v759_v55, %s1078_s4  ;;  %v856_v36 = vadd.f32 %v1749_v37, %v846_v30 }
  0xaf   :  { %778 = vrot.lane.b32.xlu2 %v757_v61, %s1078_s4 }
  0xb0   :  { %v252_v2 = vpop.permute.xlu0 %251  ;;  %v254_v43 = vpop.permute.xlu1 %253  ;;  %v864_v12 = vmax.f32 %v856_v36, 0.0 }
  0xb1   :  { %921 = vst.msk [vmem:[%s2008_s3 + $0x60] sm:$0xff] %vm161_vm0, %v252_v2  ;;  %v357_v57 = vpop.permute.xlu2 %356 }
  0xb2   :  { %922 = vst.msk [vmem:[%s2008_s3 + $0x68] sm:$0xff] %vm161_vm0, %v254_v43 }
  0xb3   :  { %933 = vst.msk [vmem:[%s2008_s3 + $0xa0] sm:$0xff] %vm161_vm0, %v357_v57 }
  0xb6   :  { %875 = vrot.lane.b32.xlu0 %v858_v47, %s1078_s4  ;;  %877 = vrot.lane.b32.xlu1 %v859_v24, %s1078_s4 }
  0xb7   :  { %873 = vrot.lane.b32.xlu2 %v857_v51, %s1078_s4 }
  0xb8   :  { %v258_v21 = vpop.permute.xlu0 %257  ;;  %v349_v16 = vpop.permute.xlu1 %348 }
  0xb9   :  { %924 = vst.msk [vmem:[%s2008_s3 + $0x78] sm:$0x7f] %vm169_vm1, %v258_v21  ;;  %v363_v35 = vpop.permute.xlu2 %362 }
  0xba   :  { %929 = vst.msk [vmem:[%s2008_s3 + $0x80] sm:$0xff] %vm161_vm0, %v349_v16 }
  0xbb   :  { %936 = vst.msk [vmem:[%s2008_s3 + $0xb8] sm:$0x7f] %vm169_vm1, %v363_v35 }
  0xbe   :  { %881 = vrot.lane.b32.xlu0 %v861_v63, %s1078_s4  ;;  %883 = vrot.lane.b32.xlu1 %v862_v31, %s1078_s4 }
  0xbf   :  { %879 = vrot.lane.b32.xlu2 %v860_v3, %s1078_s4 }
  0xc0   :  { %v353_v6 = vpop.permute.xlu0 %352  ;;  %v355_v7 = vpop.permute.xlu1 %354 }
  0xc1   :  { %931 = vst.msk [vmem:[%s2008_s3 + $0x90] sm:$0xff] %vm161_vm0, %v353_v6  ;;  %v458_v27 = vpop.permute.xlu2 %457 }
  0xc2   :  { %932 = vst.msk [vmem:[%s2008_s3 + $0x98] sm:$0xff] %vm161_vm0, %v355_v7 }
  0xc3   :  { %943 = vst.msk [vmem:[%s2008_s3 + $0xd0] sm:$0xff] %vm161_vm0, %v458_v27 }
  0xc6   :  { %887 = vrot.lane.b32.xlu0 %v864_v12, %s1078_s4 }
  0xc7   :  { %885 = vrot.lane.b32.xlu2 %v863_v0, %s1078_s4 }
  0xc8   :  { %v359_v55 = vpop.permute.xlu0 %358  ;;  %v361_v32 = vpop.permute.xlu1 %360 }
  0xc9   :  { %934 = vst.msk [vmem:[%s2008_s3 + $0xa8] sm:$0xff] %vm161_vm0, %v359_v55  ;;  %v464_v37 = vpop.permute.xlu2 %463 }
  0xca   :  { %935 = vst.msk [vmem:[%s2008_s3 + $0xb0] sm:$0xff] %vm161_vm0, %v361_v32 }
  0xcb   :  { %946 = vst.msk [vmem:[%s2008_s3 + $0xe8] sm:$0xff] %vm161_vm0, %v464_v37 }
  0xd0   :  { %v454_v33 = vpop.permute.xlu0 %453  ;;  %v456_v54 = vpop.permute.xlu1 %455 }
  0xd1   :  { %941 = vst.msk [vmem:[%s2008_s3 + $0xc0] sm:$0xff] %vm161_vm0, %v454_v33  ;;  %v559_v56 = vpop.permute.xlu2 %558 }
  0xd2   :  { %942 = vst.msk [vmem:[%s2008_s3 + $0xc8] sm:$0xff] %vm161_vm0, %v456_v54 }
  0xd3   :  { %953 = vst.msk [vmem:[%s2008_s3 + $0x100] sm:$0xff] %vm161_vm0, %v559_v56 }
  0xd8   :  { %v460_v38 = vpop.permute.xlu0 %459  ;;  %v462_v11 = vpop.permute.xlu1 %461 }
  0xd9   :  { %944 = vst.msk [vmem:[%s2008_s3 + $0xd8] sm:$0xff] %vm161_vm0, %v460_v38  ;;  %v565_v22 = vpop.permute.xlu2 %564 }
  0xda   :  { %945 = vst.msk [vmem:[%s2008_s3 + $0xe0] sm:$0xff] %vm161_vm0, %v462_v11 }
  0xdb   :  { %956 = vst.msk [vmem:[%s2008_s3 + $0x118] sm:$0xff] %vm161_vm0, %v565_v22 }
  0xe0   :  { %v466_v1 = vpop.permute.xlu0 %465  ;;  %v468_v40 = vpop.permute.xlu1 %467 }
  0xe1   :  { %947 = vst.msk [vmem:[%s2008_s3 + $0xf0] sm:$0xff] %vm161_vm0, %v466_v1  ;;  %v571_v13 = vpop.permute.xlu2 %570 }
  0xe2   :  { %948 = vst.msk [vmem:[%s2008_s3 + $0xf8] sm:$0x7f] %vm169_vm1, %v468_v40 }
  0xe3   :  { %959 = vst.msk [vmem:[%s2008_s3 + $0x130] sm:$0xff] %vm161_vm0, %v571_v13 }
  0xe8   :  { %v561_v53 = vpop.permute.xlu0 %560  ;;  %v563_v61 = vpop.permute.xlu1 %562 }
  0xe9   :  { %954 = vst.msk [vmem:[%s2008_s3 + $0x108] sm:$0xff] %vm161_vm0, %v561_v53  ;;  %v666_v14 = vpop.permute.xlu2 %665 }
  0xea   :  { %955 = vst.msk [vmem:[%s2008_s3 + $0x110] sm:$0xff] %vm161_vm0, %v563_v61 }
  0xeb   :  { %966 = vst.msk [vmem:[%s2008_s3 + $0x148] sm:$0xff] %vm161_vm0, %v666_v14 }
  0xf0   :  { %v567_v60 = vpop.permute.xlu0 %566  ;;  %v569_v45 = vpop.permute.xlu1 %568 }
  0xf1   :  { %957 = vst.msk [vmem:[%s2008_s3 + $0x120] sm:$0xff] %vm161_vm0, %v567_v60  ;;  %v672_v39 = vpop.permute.xlu2 %671 }
  0xf2   :  { %958 = vst.msk [vmem:[%s2008_s3 + $0x128] sm:$0xff] %vm161_vm0, %v569_v45 }
  0xf3   :  { %969 = vst.msk [vmem:[%s2008_s3 + $0x160] sm:$0xff] %vm161_vm0, %v672_v39 }
  0xf8   :  { %v573_v42 = vpop.permute.xlu0 %572  ;;  %v664_v2 = vpop.permute.xlu1 %663 }
  0xf9   :  { %960 = vst.msk [vmem:[%s2008_s3 + $0x138] sm:$0x7f] %vm169_vm1, %v573_v42  ;;  %v678_v47 = vpop.permute.xlu2 %677 }
  0xfa   :  { %965 = vst.msk [vmem:[%s2008_s3 + $0x140] sm:$0xff] %vm161_vm0, %v664_v2 }
  0xfb   :  { %972 = vst.msk [vmem:[%s2008_s3 + $0x178] sm:$0x7f] %vm169_vm1, %v678_v47 }
 0x100   :  { %v668_v43 = vpop.permute.xlu0 %667  ;;  %v670_v23 = vpop.permute.xlu1 %669 }
 0x101   :  { %967 = vst.msk [vmem:[%s2008_s3 + $0x150] sm:$0xff] %vm161_vm0, %v668_v43  ;;  %v773_v44 = vpop.permute.xlu2 %772 }
 0x102   :  { %968 = vst.msk [vmem:[%s2008_s3 + $0x158] sm:$0xff] %vm161_vm0, %v670_v23 }
 0x103   :  { %979 = vst.msk [vmem:[%s2008_s3 + $0x190] sm:$0xff] %vm161_vm0, %v773_v44 }
 0x108   :  { %v674_v5 = vpop.permute.xlu0 %673  ;;  %v676_v10 = vpop.permute.xlu1 %675 }
 0x109   :  { %970 = vst.msk [vmem:[%s2008_s3 + $0x168] sm:$0xff] %vm161_vm0, %v674_v5  ;;  %v779_v48 = vpop.permute.xlu2 %778 }
 0x10a   :  { %971 = vst.msk [vmem:[%s2008_s3 + $0x170] sm:$0xff] %vm161_vm0, %v676_v10 }
 0x10b   :  { %982 = vst.msk [vmem:[%s2008_s3 + $0x1a8] sm:$0xff] %vm161_vm0, %v779_v48 }
 0x110   :  { %v769_v15 = vpop.permute.xlu0 %768  ;;  %v771_v24 = vpop.permute.xlu1 %770 }
 0x111   :  { %977 = vst.msk [vmem:[%s2008_s3 + $0x180] sm:$0xff] %vm161_vm0, %v769_v15  ;;  %v874_v49 = vpop.permute.xlu2 %873 }
 0x112   :  { %978 = vst.msk [vmem:[%s2008_s3 + $0x188] sm:$0xff] %vm161_vm0, %v771_v24 }
 0x113   :  { %989 = vst.msk [vmem:[%s2008_s3 + $0x1c0] sm:$0xff] %vm161_vm0, %v874_v49 }
 0x118   :  { %v775_v52 = vpop.permute.xlu0 %774  ;;  %v777_v28 = vpop.permute.xlu1 %776 }
 0x119   :  { %980 = vst.msk [vmem:[%s2008_s3 + $0x198] sm:$0xff] %vm161_vm0, %v775_v52  ;;  %v880_v9 = vpop.permute.xlu2 %879 }
 0x11a   :  { %981 = vst.msk [vmem:[%s2008_s3 + $0x1a0] sm:$0xff] %vm161_vm0, %v777_v28 }
 0x11b   :  { %992 = vst.msk [vmem:[%s2008_s3 + $0x1d8] sm:$0xff] %vm161_vm0, %v880_v9 }
 0x120   :  { %v781_v57 = vpop.permute.xlu0 %780  ;;  %v783_v19 = vpop.permute.xlu1 %782 }
 0x121   :  { %983 = vst.msk [vmem:[%s2008_s3 + $0x1b0] sm:$0xff] %vm161_vm0, %v781_v57  ;;  %v886_v20 = vpop.permute.xlu2 %885 }
 0x122   :  { %984 = vst.msk [vmem:[%s2008_s3 + $0x1b8] sm:$0x7f] %vm169_vm1, %v783_v19 }
 0x123   :  { %995 = vst.msk [vmem:[%s2008_s3 + $0x1f0] sm:$0xff] %vm161_vm0, %v886_v20 }
 0x128   :  { %v876_v58 = vpop.permute.xlu0 %875  ;;  %v878_v59 = vpop.permute.xlu1 %877 }
 0x129   :  { %990 = vst.msk [vmem:[%s2008_s3 + $0x1c8] sm:$0xff] %vm161_vm0, %v876_v58 }
 0x12a   :  { %991 = vst.msk [vmem:[%s2008_s3 + $0x1d0] sm:$0xff] %vm161_vm0, %v878_v59 }
 0x130   :  { %v882_v29 = vpop.permute.xlu0 %881  ;;  %v884_v51 = vpop.permute.xlu1 %883 }
 0x131   :  { %993 = vst.msk [vmem:[%s2008_s3 + $0x1e0] sm:$0xff] %vm161_vm0, %v882_v29 }
 0x132   :  { %994 = vst.msk [vmem:[%s2008_s3 + $0x1e8] sm:$0xff] %vm161_vm0, %v884_v51 }
 0x138   :  { %v888_v4 = vpop.permute.xlu0 %887 }
 0x139   :  { %996 = vst.msk [vmem:[%s2008_s3 + $0x1f8] sm:$0x7f] %vm169_vm1, %v888_v4 }
 0x13a   :  { %910 = vsyncpa [#allocation6], 1 }

</bundles_post_ra>
